<compile_context>
chip_gen: v5e
topology: v5e:2x2
jax: 0.10.0
libtpu: 0.0.40
codegen_flags: <defaults>
</compile_context>

<pallas_src>
import jax
import jax.numpy as jnp
from jax.experimental import pallas as pl
from jax.experimental.pallas import tpu as pltpu


def _make_kernel(compute_dtype):
    def kernel(alpha_ref, x_ref, o_ref):
        # alpha_ref: SMEM (2,) f32 -- [real_slope, imag_slope]; grid axis 1
        # selects the half, so the slope is a single scalar SMEM read.
        a = alpha_ref[pl.program_id(1)].astype(compute_dtype)
        x = x_ref[...].astype(compute_dtype)
        o_ref[...] = jnp.where(x >= 0, x, a * x).astype(o_ref.dtype)

    return kernel


def _sublane_pack(dtype):
    """Sublane packing factor: 8 for f32, 16 for bf16, 32 for int8/fp8."""
    return max(8, 32 // jnp.dtype(dtype).itemsize)


def _chip_tuning():
    """(target_block_bytes, vmem_limit_bytes_or_None, device_kind) per chip."""
    kind = ""
    try:
        kind = jax.devices()[0].device_kind.lower()
    except Exception:
        pass
    if "v7" in kind:
        # 6 MiB blocks -> ~24 MiB double-buffered in+out; allow it explicitly
        # (v7x scoped default is 32 MiB, physical 64 MiB).
        target, limit = 6 * 1024 * 1024, 48 * 1024 * 1024
    elif "v6" in kind:
        # 4 MiB blocks -> ~16 MiB resident, fits the 32 MiB scoped default.
        target, limit = 4 * 1024 * 1024, 32 * 1024 * 1024
    else:
        # v5e / unknown: 2 MiB blocks -> ~8 MiB resident under the 16 MiB
        # scoped-VMEM default; already within ~7% of the 0.82 TB/s roofline.
        target, limit = 2 * 1024 * 1024, None
    if limit is not None:
        try:  # never ask for more than physical VMEM minus headroom
            cap = int(pltpu.get_tpu_info().vmem_capacity_bytes)
            limit = max(16 * 1024 * 1024, min(limit, cap - 8 * 1024 * 1024))
        except Exception:
            pass
    return target, limit, kind


def _even_tile_rows(rows, rows_cap, pack):
    """rows if it fits; else the largest divisor of rows that is a multiple of
    `pack` and <= rows_cap (even split, no ragged tail); else None."""
    if rows <= rows_cap:
        return rows
    for d in range(rows_cap // pack * pack, pack - 1, -pack):
        if rows % d == 0:
            return d
    return None


def _choose_layout_and_tile(m, itemsize, pack, target_bytes):
    """Search lane widths (multiples of 128 dividing m, widest first) for one
    that gives >= pack rows AND an even, pack-aligned row split into blocks of
    <= target_bytes. Returns (R, L, tile_r) or None if m has no 128-factor."""
    ragged = None  # >= pack rows but only a ragged split exists
    thin = None    # fewer than `pack` rows (tiny slabs); keep the densest
    for lanes in range(4096, 127, -128):
        if m % lanes:
            continue
        rows = m // lanes
        rows_cap = max(pack, (target_bytes // (lanes * itemsize)) // pack * pack)
        if rows >= pack:
            tile_r = _even_tile_rows(rows, rows_cap, pack)
            if tile_r is not None:
                return rows, lanes, tile_r
            if ragged is None:
                ragged = (rows, lanes, rows_cap)
        else:
            thin = (rows, lanes, rows)  # keep overwriting -> most rows wins
    return ragged or thin


def cprelu(x, alpha_real, alpha_imag, *, donate=False):
    """Complex PReLU over NCHW input. Channels split in half (real | imag)."""
    B, C, H, W = x.shape
    assert C % 2 == 0, "channel axis must be even (real/imag halves)"
    half = C // 2
    m = half * H * W  # elements per (batch, half) slab

    itemsize = jnp.dtype(x.dtype).itemsize
    pack = _sublane_pack(x.dtype)
    target_bytes, vmem_limit, kind = _chip_tuning()

    choice = _choose_layout_and_tile(m, itemsize, pack, target_bytes)
    if choice is None:
        # No multiple-of-128 factorization of m: pick the natural contiguous
        # split with the densest last dim (fewest masked lanes per store).
        def lane_eff(l):
            return l / (pl.cdiv(l, 128) * 128)

        cands = [l for l in {W, H * W, m} if l * itemsize <= target_bytes]
        L = max(cands, key=lambda l: (lane_eff(l), l)) if cands else W
        R = m // L
        rows_cap = max(pack, (target_bytes // (L * itemsize)) // pack * pack)
        tile_r = _even_tile_rows(R, rows_cap, pack) or min(R, rows_cap)
    else:
        R, L, tile_r = choice
    n_chunks = pl.cdiv(R, tile_r)

    # Free reshape: per batch, the real half (channels [0, C/2)) and the imag
    # half stay contiguous, so (B, C, H, W) -> (B, 2, R, L) moves no data.
    x4 = x.reshape(B, 2, R, L)

    # bf16 computes natively on v6e/v7x; f32 compute elsewhere (v5e has no
    # bf16 VALU) and for f32 inputs (casts become no-ops).
    if x.dtype == jnp.bfloat16 and ("v6" in kind or "v7" in kind):
        compute_dtype = jnp.bfloat16
    else:
        compute_dtype = jnp.float32

    alphas = jnp.stack(
        [jnp.asarray(alpha_real, jnp.float32), jnp.asarray(alpha_imag, jnp.float32)]
    )

    grid_spec = pltpu.PrefetchScalarGridSpec(
        num_scalar_prefetch=1,
        grid=(B, 2, n_chunks),
        in_specs=[
            pl.BlockSpec((1, 1, tile_r, L), lambda b, h, k, alphas: (b, h, k, 0)),
        ],
        out_specs=pl.BlockSpec((1, 1, tile_r, L), lambda b, h, k, alphas: (b, h, k, 0)),
    )

    cp_kwargs = dict(dimension_semantics=("parallel", "parallel", "parallel"))
    if vmem_limit is not None:
        cp_kwargs["vmem_limit_bytes"] = int(vmem_limit)

    call_kwargs = {}
    if donate:
        # Data input is arg index 1 (after the scalar-prefetch alphas).
        call_kwargs["input_output_aliases"] = {1: 0}

    out = pl.pallas_call(
        _make_kernel(compute_dtype),
        out_shape=jax.ShapeDtypeStruct((B, 2, R, L), x.dtype),
        grid_spec=grid_spec,
        compiler_params=pltpu.CompilerParams(**cp_kwargs),
        cost_estimate=pl.CostEstimate(
            flops=2 * x.size, transcendentals=0, bytes_accessed=2 * x.size * itemsize
        ),
        **call_kwargs,
    )(alphas, x4)

    return out.reshape(B, C, H, W)


def cprelu_ref(x, alpha_real, alpha_imag):
    """Pure-JAX reference matching the PyTorch cPReLU forward."""
    C = x.shape[1]
    real, imag = x[:, : C // 2], x[:, C // 2 :]
    real = jnp.where(real >= 0, real, alpha_real * real)
    imag = jnp.where(imag >= 0, imag, alpha_imag * imag)
    return jnp.concatenate([real, imag], axis=1)


if __name__ == "__main__":
    key = jax.random.PRNGKey(0)
    # nn.PReLU() default init is 0.25 per branch; use distinct slopes so the
    # per-half slope selection is actually exercised.
    alpha_real, alpha_imag = 0.25, 0.1

    tests = [
        ((2, 4, 16, 16), jnp.float32),     # small module-like shape, lane-dense
        ((2, 6, 10, 18), jnp.float32),     # no 128-factor -> fallback layout
        ((1, 2, 1200, 512), jnp.float32),  # multi-chunk / even row split path
        ((2, 8, 16, 128), jnp.bfloat16),   # bf16 (native compute on v6e/v7x)
    ]
    keys = jax.random.split(key, len(tests))
    for k, (shape, dt) in zip(keys, tests):
        x = jax.random.normal(k, shape, dtype=jnp.float32).astype(dt)
        out = jax.block_until_ready(cprelu(x, alpha_real, alpha_imag))
        ref = cprelu_ref(x, alpha_real, alpha_imag)
        assert out.shape == x.shape and out.dtype == x.dtype
        tol = 1e-6 if dt == jnp.float32 else 2e-2
        assert jnp.allclose(out, ref, atol=tol, rtol=tol), shape

    print("KERNEL_OK")
</pallas_src>

<mosaic_0001>
module attributes {stable_mosaic.version = 11 : i64} {
  func.func @kernel(%arg0: i32, %arg1: i32, %arg2: i32, %arg3: memref<2xf32, #tpu.memory_space<smem>>, %arg4: memref<1x1x4x128xf32, #tpu.memory_space<vmem>>, %arg5: memref<1x1x4x128xf32, #tpu.memory_space<vmem>>) attributes {dimension_semantics = [#tpu.dimension_semantics<parallel>, #tpu.dimension_semantics<parallel>, #tpu.dimension_semantics<parallel>], iteration_bounds = array<i64: 2, 2, 1>, scalar_prefetch = 1 : i64, scratch_operands = 0 : i64, tpu.core_type = #tpu.core_type<tc>, window_params = [{transform_indices = @transform_0, window_bounds = array<i64: 1, 1, 4, 128>}, {transform_indices = @transform_1, window_bounds = array<i64: 1, 1, 4, 128>}]} {
    %0 = arith.index_cast %arg1 : i32 to index
    %1 = memref.load %arg3[%0] : memref<2xf32, #tpu.memory_space<smem>>
    %c0 = arith.constant 0 : index
    %c0_0 = arith.constant 0 : index
    %c0_1 = arith.constant 0 : index
    %c0_2 = arith.constant 0 : index
    %2 = vector.load %arg4[%c0, %c0_0, %c0_1, %c0_2] : memref<1x1x4x128xf32, #tpu.memory_space<vmem>>, vector<1x1x4x128xf32>
    %cst = arith.constant 0.000000e+00 : f32
    %3 = vector.broadcast %cst : f32 to vector<1x1x4x128xf32>
    %4 = arith.cmpf oge, %2, %3 : vector<1x1x4x128xf32>
    %5 = vector.broadcast %1 : f32 to vector<1x1x4x128xf32>
    %6 = arith.mulf %5, %2 : vector<1x1x4x128xf32>
    %7 = arith.select %4, %2, %6 : vector<1x1x4x128xi1>, vector<1x1x4x128xf32>
    %c0_3 = arith.constant 0 : index
    %c0_4 = arith.constant 0 : index
    %c0_5 = arith.constant 0 : index
    %c0_6 = arith.constant 0 : index
    %8 = vector.load %arg5[%c0_3, %c0_4, %c0_5, %c0_6] : memref<1x1x4x128xf32, #tpu.memory_space<vmem>>, vector<1x1x4x128xf32>
    tpu.vector_store %arg5[%c0_3, %c0_4, %c0_5, %c0_6], %7 {strides = array<i32>} : memref<1x1x4x128xf32, #tpu.memory_space<vmem>>, vector<1x1x4x128xf32>,
    return
  }
  func.func @transform_0(%arg0: i32, %arg1: i32, %arg2: i32, %arg3: memref<2xf32, #tpu.memory_space<smem>>) -> (i32, i32, i32, i32) {
    %c0_i32 = arith.constant 0 : i32
    %c0_i32_0 = arith.constant 0 : i32
    return %arg0, %arg1, %arg2, %c0_i32 : i32, i32, i32, i32
  }
  func.func @transform_1(%arg0: i32, %arg1: i32, %arg2: i32, %arg3: memref<2xf32, #tpu.memory_space<smem>>) -> (i32, i32, i32, i32) {
    %c0_i32 = arith.constant 0 : i32
    %c0_i32_0 = arith.constant 0 : i32
    return %arg0, %arg1, %arg2, %c0_i32 : i32, i32, i32, i32
  }
}

</mosaic_0001>

<bundles_post_ra>
// kernel: tpu_custom_call.1
= control target key start
LH: loop header
LB: loop body
LE: loop exit
PB: predicated region body
PF: predicated region fallthrough
CT: control target
= control target key end

     0   :  { %s527_s12 = smov [#allocation3]   ;;  %s689_s0 = inlined_call_operand.hbm [shape: f32[2], index: 0, kind: input, shape index: {}]   ;;  %s690_s1 = inlined_call_operand.hbm [shape: f32[2,2,4,128], index: 1, kind: input, shape index: {}]   ;;  %s691_s2 = inlined_call_operand.hbm [shape: f32[2,2,4,128], index: 2, kind: output, shape index: {}]  }
   0x1   :  { %s8_s11 = sshll.u32 %s689_s0, 4  ;;  %s9_s11 = int_to_ptr.hbm [resolvable:$true] %s8_s11 }
   0x2   :  { %11 = dma.hbm_to_smem %s9_s11, 16, %s527_s12, [#allocation2] }
   0x3   :  { %485 = dma.done.wait [#allocation2], 16 }
   0x4   :  { %486 = vsyncadd [#allocation2], 4294967280 }
   0x5   :  { %14 = sfence }
   0x6   :  { %15 = vsyncpa [#allocation5], 0 }
   0x7   :  { %17 = vsyncpa [#allocation5 + $0x1], 0 }
   0x8   :  { %18 = vsyncpa [#allocation6], 0 }
   0x9   :  { %20 = vsyncpa [#allocation6 + $0x1], 0  ;;  %s546_s13 = smov 0   ;;  %s548_s14 = smov 0  }
   0xa   :  { %s550_s15 = smov 0   ;;  %s552_s16 = smov 0  }
   0xb   :  { %s554_s17 = smov 0   ;;  %s556_s0 = smov 0  }
   0xc   :  { %s558_s18 = smov 0   ;;  %s560_s19 = smov 0  }
   0xd LB: > { %s289_s20 = sadd.s32 4294967295, %s525_s19   ;;  %s290_s21 = sadd.s32 4294967294, %s525_s19   ;;  %s525_s19 = sphi %s560_s19, %s26_s19   ;;  %s521_s18 = sphi %s558_s18, %s702_s18   ;;  %s517_s0 = sphi %s556_s0, %s701_s0   ;;  %s513_s17 = sphi %s554_s17, %s700_s17   ;;  %s509_s16 = sphi %s552_s16, %s699_s16   ;;  %s505_s15 = sphi %s550_s15, %s698_s15   ;;  %s501_s14 = sphi %s548_s14, %s697_s14   ;;  %s497_s13 = sphi %s546_s13, %s696_s13  }
   0xe   : > { %s41_s22 = sadd.s32 1, %s517_s0  ;;  %s45_s23 = sadd.s32 1, %s521_s18 }
   0xf   : > { %p43_p0 = scmp.ge.s32.totalorder %s41_s22, 2  ;;  %s56_s24 = sadd.s32 1, %s505_s15 }
  0x10   : > { %p63_p1 = scmp.ne.s32.totalorder %s505_s15, %s501_s14  ;;  %p64_p2 = scmp.eq.s32.totalorder %s525_s19, 0 }
  0x11   : > { %s704_s22 = smov (%p43_p0, %s41_s22), 0  ;;  %s706_s23 = smov (!%p43_p0, %s45_s23), %s521_s18 }
  0x12   : > { %s50_s25 = ssub.s32 %s517_s0, %s704_s22  ;;  %p599_p3 = por %p64_p2, %p63_p1 }
  0x13   : > { %p47_p4 = scmp.ge.s32.totalorder %s706_s23, 2  ;;  %p69_p5 = scmp.ne.s32.totalorder %s501_s14, %s497_s13 }
  0x14   : > { %p70_p6 = scmp.eq.s32.totalorder %s289_s20, 0  ;;  %p97_p7 = scmp.eq.s32.totalorder %s289_s20, 3 }
  0x15   : > { %s708_s23 = smov (%p47_p4, %s706_s23), 0  ;;  %p103_p10 = scmp.eq.s32.totalorder %s290_s21, 3 }
  0x16   : > { %p607_p8 = por %p70_p6, %p69_p5  ;;  %p611_p9 = por %p97_p7, %p63_p1 }
  0x17   : > { %s49_s29 = ssub.s32 %s521_s18, %s708_s23  ;;  %p617_p12 = por %p103_p10, %p69_p5 }
  0x18   : > { %s51_s30 = sor.u32 %s50_s25, %s49_s29  ;;  %p316_p13 = scmp.lt.s32.totalorder %s525_s19, 4 }
  0x19   : > { %p54_p11 = scmp.eq.s32.totalorder %s51_s30, 0  ;;  %s123_s4 = sand.u32 1, %s505_s15  }
  0x1a   : > { %s293_s6 = sshll.u32 %s123_s4, 2  ;;  %s294_s7 = sshll.u32 %s521_s18, 1 }
  0x1b   : > { %s624_s5 = scalar_select %p54_p11, %s505_s15, %s56_s24  }
  0x1c   : > { %s132_s8 = sadd.s32 %s517_s0, %s294_s7  ;;  %s127_s9 = scalar_lea.vmem [#allocation4], %s293_s6 }
  0x1d   : > { %s138_s10 = sshll.u32 %s127_s9, 4  ;;  %s295_s11 = sshll.u32 %s132_s8, 2  ;;  %s139_s10 = int_to_ptr.vmem [resolvable:$true] %s138_s10 }
  0x1e   : > { %s134_s21 = scalar_lea.hbm %s690_s1, %s295_s11  ;;  %p309_p0 = pnand %p316_p13, %p599_p3 }
  0x1f   : > { %s136_s25 = sshll.u32 %s134_s21, 4  ;;  %p296_p1 = scmp.ge.s32.totalorder %s525_s19, 1  ;;  %s137_s25 = int_to_ptr.hbm [resolvable:$true] %s136_s25 }
  0x20   : > { %s124_s29 = scalar_lea.sflag [#allocation5], %s123_s4  ;;  %p143_p2 = scmp.lt.s32.totalorder %s525_s19, 5 }
  0x21   : > { %311 = dma.hbm_to_vmem [thread:$0]  (!%p309_p0), %s137_s25, 64, %s139_s10, %s124_s29  }
  0x22   : > { %p144_p4 = pnand %p296_p1, %p143_p2 }
  0x23   : > { %s636_s24 = sand.u32 (!%p144_p4), 1, %s501_s14  }
  0x24   : > { %147 = sbr.rel (%p144_p4) target bundleno = 59 (0x3b), region = 24  ;;  %s297_s30 = sshll.u32 (!%p144_p4), %s636_s24, 2 }
  0x25   : > { %s150_s6 = scalar_lea.sflag (!%p144_p4), [#allocation5], %s636_s24  ;;  %s153_s7 = scalar_lea.vmem (!%p144_p4), [#allocation4], %s297_s30 }
  0x29   : > { %488 = dma.done.wait (%p607_p8), %s150_s6, 64  }
  0x2a   : > { %490 = vsyncadd (%p607_p8), %s150_s6, 4294967232  ;;  %s173_s26 = sld [smem:[#allocation3 + %s509_s16]]  ;;  %s300_s4 = sshll.u32 %s513_s17, 1  ;;  %v174_v1 = vld [vmem:[%s153_s7] sm:$0xf] }
  0x2b   : > { %s192_s8 = sadd.s32 %s509_s16, %s300_s4  ;;  %s172_s20 = scalar_lea.vmem [#allocation7], %s297_s30  ;;  %vm175_vm0 = vcmp.ge.f32.partialorder %v174_v1, 0.0 }
  0x2c   : > { %s301_s9 = sshll.u32 %s192_s8, 2  ;;  %s196_s21 = sshll.u32 %s172_s20, 4  ;;  %s197_s21 = int_to_ptr.vmem [resolvable:$true] %s196_s21 }
  0x2d   : > { %s194_s12 = scalar_lea.hbm %s691_s2, %s301_s9  ;;  %s181_s27 = scalar_lea.sflag [#allocation6], %s636_s24 }
  0x2e   : > { %s198_s25 = sshll.u32 %s194_s12, 4  ;;  %s445_s6 = scalar_lea.hbm %s691_s2, 16  ;;  %s199_s25 = int_to_ptr.hbm [resolvable:$true] %s198_s25 }
  0x2f   : > { %s439_s17 = sshra.s32 %s199_s25, 4  ;;  %s440_s17 = int_to_ptr.hbm [resolvable:$true] %s439_s17 }
  0x30   : > { %v176_v0 = vstv %s173_s26  ;;  %s441_s16 = scalar_lea.hbm %s440_s17, 4  ;;  %p446_p7 = scmp.lt.s32.totalorder %s440_s17, %s691_s2 }
  0x31   : > { %v177_v2 = vmul.f32 %v176_v0, %v174_v1  ;;  %p442_p3 = scmp.ne.s32.totalorder %s440_s17, %s441_s16  ;;  %p447_p8 = scmp.lt.s32.totalorder %s445_s6, %s441_s16 }
  0x33   : > { %v178_v3 = vsel %vm175_vm0, %v174_v1, %v177_v2  ;;  %p443_p5 = pnand %p442_p3, %p611_p9  ;;  %p448_p10 = por %p447_p8, %p446_p7 }
  0x34   : > { %179 = vst [vmem:[%s172_s20] sm:$0xf] %v178_v3 }
  0x35   : > { %p444_p6 = pneg %p443_p5 }
  0x37   : > { %p449_p11 = pnand %p448_p10, %p444_p6 }
  0x39   : > { %452 = shalt.err (!%p449_p11)
}
  0x3a   : > { %306 = dma.vmem_to_hbm [thread:$0]  (%p611_p9), %s197_s21, 64, %s199_s25, %s181_s27  }
  0x3b PF: > { %p317_p13 = scmp.ge.s32.totalorder %s525_s19, 2  ;;  %s210_s24 = sand.u32 1, %s497_s13  }
  0x3c   : > { %s211_s4 = scalar_lea.sflag [#allocation6], %s210_s24 }
  0x3d   : > { %p313_p0 = pnand %p317_p13, %p617_p12 }
  0x3f   : > { %p314_p1 = pneg %p313_p0 }
  0x41   : > { %492 = dma.done.wait (%p314_p1), %s211_s4, 64  }
  0x42   : > { %494 = vsyncadd (%p314_p1), %s211_s4, 4294967232  ;;  %s26_s19 = sadd.s32 1, %s525_s19   ;;  %s696_s13 = smov %s501_s14 }
  0x43   : > { %p23_p2 = scmp.ge.s32.totalorder %s26_s19, 6   ;;  %s697_s14 = smov %s505_s15 }
  0x44   : > { %s698_s15 = smov %s624_s5  ;;  %s699_s16 = smov %s517_s0 }
  0x45   : > { %s700_s17 = smov %s521_s18  ;;  %s701_s0 = smov %s704_s22 }
  0x46   : > { %s702_s18 = smov %s708_s23  ;;  %25 = sbr.rel (!%p23_p2) target bundleno = 13 (0xd), region = 69 }
  0x4b   :  { %217 = vsyncpa [#allocation5], 1 }
  0x4c   :  { %219 = vsyncpa [#allocation5 + $0x1], 1 }
  0x4d   :  { %220 = vsyncpa [#allocation6], 1 }
  0x4e   :  { %222 = vsyncpa [#allocation6 + $0x1], 1 }

</bundles_post_ra>
